<compile_context>
chip_gen: v7x
topology: tpu7x:2x2x1
jax: 0.10.0
libtpu: 0.0.40
codegen_flags: <defaults>
</compile_context>

<pallas_src>
import math
import jax
import jax.numpy as jnp
from jax.experimental import pallas as pl
from jax.experimental.pallas import tpu as pltpu

D_MODEL   = 32
NUM_HEADS = 4
HEAD_DIM  = D_MODEL // NUM_HEADS
D_FF      = 64
RMS_EPS   = float(jnp.finfo(jnp.float32).eps)   # torch nn.RMSNorm(eps=None) default


def _make_kernel(B, L):
    BL = B * L
    H, hd, D = NUM_HEADS, HEAD_DIM, D_MODEL

    def kernel(x_ref, wqkv_ref, wo_ref, w12_ref, w3_ref, aux_ref, out_ref):
        x = x_ref[...]                                        # (BL, D) f32
        x_bf = x.astype(jnp.bfloat16)
        aux = aux_ref[...]                                    # (3, D) f32
        bo, g1, g2 = aux[0:1], aux[1:2], aux[2:3]

        # ---- head-batched QKV projection (no lane-axis head slices) ----
        # wqkv_ref: (3H, D, hd) bf16, batch order [Q h0..3 | K h0..3 | V h0..3];
        # 1/sqrt(hd) pre-folded into the Q slices at init time.
        xh = jnp.broadcast_to(x_bf.reshape(1, BL, D), (3 * H, BL, D))
        qkvh = jnp.einsum('gnc,gcd->gnd', xh, wqkv_ref[...],
                          preferred_element_type=jnp.float32)  # (3H, BL, hd) f32

        def heads(a):   # (H, BL, hd) -> (H*B, L, hd): leading-axis-only reshape
            return a.reshape(H * B, L, hd).astype(jnp.bfloat16)

        q = heads(qkvh[0:H])
        k = heads(qkvh[H:2 * H])
        v = heads(qkvh[2 * H:3 * H])

        # ---- fused-head attention: ONE score einsum, ONE softmax, ONE ctx einsum ----
        # (attention-weight dropout = identity in eval; no mask, matching reference)
        s = jnp.einsum('bld,bmd->blm', q, k,
                       preferred_element_type=jnp.float32)     # (H*B, L, L) f32
        s = s - jnp.max(s, axis=-1, keepdims=True)
        p = jnp.exp(s)
        p = p * pl.reciprocal(jnp.sum(p, axis=-1, keepdims=True), approx=True)
        ctx = jnp.einsum('blm,bmd->bld', p.astype(jnp.bfloat16), v,
                         preferred_element_type=jnp.float32)   # (H*B, L, hd) f32

        # ---- output projection: head-batched matmul + leading-axis sum over heads ----
        ctx_h = ctx.reshape(H, BL, hd).astype(jnp.bfloat16)    # leading-axis reshape
        attn = jnp.einsum('hnd,hdo->hno', ctx_h, wo_ref[...],
                          preferred_element_type=jnp.float32)  # (H, BL, D) f32
        attn = jnp.sum(attn, axis=0) + bo                      # (BL, D)

        # ---- residual + RMSNorm1 (f32) ----
        x1 = x + attn
        x1 = x1 * jax.lax.rsqrt(jnp.mean(x1 * x1, axis=-1, keepdims=True) + RMS_EPS)
        x1 = x1 * g1

        # ---- GLU feed-forward: fused w1|w2 -> one lane-dense (32, 128) matmul ----
        h12 = jnp.dot(x1.astype(jnp.bfloat16), w12_ref[...],
                      preferred_element_type=jnp.float32)      # (BL, 2*d_ff) f32
        h1 = h12[:, :D_FF]
        h2 = h12[:, D_FF:]
        gated = (h1 * jax.nn.sigmoid(h1)) * h2                 # silu(h1) * h2, f32
        ff = jnp.dot(gated.astype(jnp.bfloat16), w3_ref[...],
                     preferred_element_type=jnp.float32)       # (BL, D)

        # ---- residual + RMSNorm2 (f32) ----
        x2 = x1 + ff
        x2 = x2 * jax.lax.rsqrt(jnp.mean(x2 * x2, axis=-1, keepdims=True) + RMS_EPS)
        x2 = x2 * g2

        # Last dim is 32 (< 128 lanes): at BL=16 masked stores cost less than an
        # in-kernel relayout to a 128-lane view would; revisit if L/D grow.
        out_ref[...] = x2.astype(out_ref.dtype)

    return kernel


def transformer_block(x, params):
    B, L, D = x.shape
    assert D == D_MODEL
    BL = B * L
    x2d = x.reshape(BL, D)                                     # free, wrapper-side

    vmem = pl.BlockSpec(memory_space=pltpu.MemorySpace.VMEM)   # whole array in VMEM
    out2d = pl.pallas_call(
        _make_kernel(B, L),
        out_shape=jax.ShapeDtypeStruct((BL, D), jnp.float32),
        in_specs=[vmem] * 6,
        out_specs=vmem,
        # Single invocation (no grid): best for v5e/v6e (1 TC) and for this toy size
        # on v7x.  At larger B*L add a "parallel" row grid for v7x's second TC.
    )(x2d, params["wqkv_hb"], params["wo_hdo"], params["w12_t"],
      params["w3_t"], params["aux"])
    return out2d.reshape(B, L, D)


def init_params(key):
    ks = jax.random.split(key, 6)
    s = 0.05
    scale = 1.0 / math.sqrt(HEAD_DIM)
    H, hd, D = NUM_HEADS, HEAD_DIM, D_MODEL

    # torch Linear stores (out, in); y = x @ W.T.  All layout transforms are done
    # here (parameter transform, not per-call) so the kernel does plain matmuls.
    wqkv = jax.random.normal(ks[0], (3 * D, D), jnp.float32) * s
    wo   = jax.random.normal(ks[1], (D, D), jnp.float32) * s
    bo   = jax.random.normal(ks[2], (D,), jnp.float32) * s
    w1   = jax.random.normal(ks[3], (D_FF, D), jnp.float32) * s
    w2   = jax.random.normal(ks[4], (D_FF, D), jnp.float32) * s
    w3   = jax.random.normal(ks[5], (D, D_FF), jnp.float32) * s

    # (3D, D) rows [Q|K|V], each head-major -> (3, H, hd, D) -> (3H, D, hd);
    # batch order [Q h0..3 | K h0..3 | V h0..3]; fold 1/sqrt(hd) into Q.
    wqkv_hb = wqkv.reshape(3, H, hd, D).transpose(0, 1, 3, 2).reshape(3 * H, D, hd)
    wqkv_hb = wqkv_hb.at[:H].multiply(scale)

    wo_hdo = wo.T.reshape(H, hd, D)                            # (H, hd, D)
    w12_t  = jnp.concatenate([w1.T, w2.T], axis=1)             # (D, 2*d_ff) lane-dense
    ones   = jnp.ones((D,), jnp.float32)                       # nn.RMSNorm weight = 1
    aux    = jnp.stack([bo, ones, ones], axis=0)               # (3, D): [bo; g1; g2]

    return {
        "wqkv_hb": wqkv_hb.astype(jnp.bfloat16),               # bf16 MXU inputs
        "wo_hdo":  wo_hdo.astype(jnp.bfloat16),
        "w12_t":   w12_t.astype(jnp.bfloat16),
        "w3_t":    w3.T.astype(jnp.bfloat16),                  # (d_ff, D)
        "aux":     aux,                                        # f32 side params
    }


if __name__ == "__main__":
    B, L = 2, 8
    key = jax.random.PRNGKey(0)
    k_x, k_p = jax.random.split(key)
    x = jax.random.normal(k_x, (B, L, D_MODEL), jnp.float32)
    params = init_params(k_p)

    out = transformer_block(x, params)
    jax.block_until_ready(out)
    assert out.shape == (B, L, D_MODEL)
    print("KERNEL_OK")
</pallas_src>

<mosaic_0001>
module attributes {stable_mosaic.version = 11 : i64} {
  func.func @kernel(%arg0: memref<16x32xf32, #tpu.memory_space<vmem>>, %arg1: memref<12x32x8xbf16, #tpu.memory_space<vmem>>, %arg2: memref<4x8x32xbf16, #tpu.memory_space<vmem>>, %arg3: memref<32x128xbf16, #tpu.memory_space<vmem>>, %arg4: memref<64x32xbf16, #tpu.memory_space<vmem>>, %arg5: memref<3x32xf32, #tpu.memory_space<vmem>>, %arg6: memref<16x32xf32, #tpu.memory_space<vmem>>) attributes {dimension_semantics = [], scalar_prefetch = 0 : i64, scratch_operands = 0 : i64, tpu.core_type = #tpu.core_type<tc>} {
    %c0 = arith.constant 0 : index
    %c0_0 = arith.constant 0 : index
    %0 = vector.load %arg0[%c0, %c0_0] : memref<16x32xf32, #tpu.memory_space<vmem>>, vector<16x32xf32>
    %1 = arith.truncf %0 : vector<16x32xf32> to vector<16x32xbf16>
    %c0_1 = arith.constant 0 : index
    %c0_2 = arith.constant 0 : index
    %2 = vector.load %arg5[%c0_1, %c0_2] : memref<3x32xf32, #tpu.memory_space<vmem>>, vector<3x32xf32>
    %3 = vector.extract_strided_slice %2 {offsets = [0, 0], sizes = [1, 32], strides = [1, 1]} : vector<3x32xf32> to vector<1x32xf32>
    %4 = vector.extract_strided_slice %2 {offsets = [1, 0], sizes = [1, 32], strides = [1, 1]} : vector<3x32xf32> to vector<1x32xf32>
    %5 = vector.extract_strided_slice %2 {offsets = [2, 0], sizes = [1, 32], strides = [1, 1]} : vector<3x32xf32> to vector<1x32xf32>
    %6 = vector.shape_cast %1 : vector<16x32xbf16> to vector<1x16x32xbf16>
    %7 = vector.shape_cast %6 : vector<1x16x32xbf16> to vector<1x16x32xbf16>
    %8 = vector.broadcast %7 : vector<1x16x32xbf16> to vector<12x16x32xbf16>
    %c0_3 = arith.constant 0 : index
    %c0_4 = arith.constant 0 : index
    %c0_5 = arith.constant 0 : index
    %9 = vector.load %arg1[%c0_3, %c0_4, %c0_5] : memref<12x32x8xbf16, #tpu.memory_space<vmem>>, vector<12x32x8xbf16>
    "tpu.trace_start"() <{level = 10 : i32, message = "gnc,gcd->gnd"}> : () -> ()
    %cst = arith.constant dense<0.000000e+00> : vector<12x16x8xf32>
    %10 = tpu.matmul %8, %9, %cst {dimension_numbers = #tpu.dot_dimension_numbers<[2], [1], [1], [2], [0, 0, 0, 1, 1, 2], [0], [0]>} : vector<12x16x32xbf16>, vector<12x32x8xbf16>, vector<12x16x8xf32> -> vector<12x16x8xf32>
    "tpu.trace_stop"() : () -> ()
    %11 = vector.extract_strided_slice %10 {offsets = [0, 0, 0], sizes = [4, 16, 8], strides = [1, 1, 1]} : vector<12x16x8xf32> to vector<4x16x8xf32>
    %12 = vector.shape_cast %11 : vector<4x16x8xf32> to vector<8x8x8xf32>
    %13 = arith.truncf %12 : vector<8x8x8xf32> to vector<8x8x8xbf16>
    %14 = vector.extract_strided_slice %10 {offsets = [4, 0, 0], sizes = [4, 16, 8], strides = [1, 1, 1]} : vector<12x16x8xf32> to vector<4x16x8xf32>
    %15 = vector.shape_cast %14 : vector<4x16x8xf32> to vector<8x8x8xf32>
    %16 = arith.truncf %15 : vector<8x8x8xf32> to vector<8x8x8xbf16>
    %17 = vector.extract_strided_slice %10 {offsets = [8, 0, 0], sizes = [4, 16, 8], strides = [1, 1, 1]} : vector<12x16x8xf32> to vector<4x16x8xf32>
    %18 = vector.shape_cast %17 : vector<4x16x8xf32> to vector<8x8x8xf32>
    %19 = arith.truncf %18 : vector<8x8x8xf32> to vector<8x8x8xbf16>
    "tpu.trace_start"() <{level = 10 : i32, message = "bld,bmd->blm"}> : () -> ()
    %cst_6 = arith.constant dense<0.000000e+00> : vector<8x8x8xf32>
    %20 = tpu.matmul %13, %16, %cst_6 {dimension_numbers = #tpu.dot_dimension_numbers<[2], [2], [1], [1], [0, 0, 0, 1, 1, 1], [0], [0]>} : vector<8x8x8xbf16>, vector<8x8x8xbf16>, vector<8x8x8xf32> -> vector<8x8x8xf32>
    "tpu.trace_stop"() : () -> ()
    %cst_7 = arith.constant dense<0xFF800000> : vector<8x8xf32>
    %21 = vector.multi_reduction <maximumf>, %20, %cst_7 [2] : vector<8x8x8xf32> to vector<8x8xf32>
    %22 = vector.shape_cast %21 : vector<8x8xf32> to vector<8x8x1xf32>
    %23 = vector.broadcast %22 : vector<8x8x1xf32> to vector<8x8x8xf32>
    %24 = arith.subf %20, %23 : vector<8x8x8xf32>
    %25 = math.exp %24 : vector<8x8x8xf32>
    %cst_8 = arith.constant dense<0.000000e+00> : vector<8x8xf32>
    %26 = vector.multi_reduction <add>, %25, %cst_8 [2] : vector<8x8x8xf32> to vector<8x8xf32>
    %27 = vector.shape_cast %26 : vector<8x8xf32> to vector<8x8x1xf32>
    %28 = tpu.reciprocal %27 {approx = true} : vector<8x8x1xf32> -> vector<8x8x1xf32>
    %29 = vector.broadcast %28 : vector<8x8x1xf32> to vector<8x8x8xf32>
    %30 = arith.mulf %25, %29 : vector<8x8x8xf32>
    %31 = arith.truncf %30 : vector<8x8x8xf32> to vector<8x8x8xbf16>
    "tpu.trace_start"() <{level = 10 : i32, message = "blm,bmd->bld"}> : () -> ()
    %cst_9 = arith.constant dense<0.000000e+00> : vector<8x8x8xf32>
    %32 = tpu.matmul %31, %19, %cst_9 {dimension_numbers = #tpu.dot_dimension_numbers<[2], [1], [1], [2], [0, 0, 0, 1, 1, 2], [0], [0]>} : vector<8x8x8xbf16>, vector<8x8x8xbf16>, vector<8x8x8xf32> -> vector<8x8x8xf32>
    "tpu.trace_stop"() : () -> ()
    %33 = vector.shape_cast %32 : vector<8x8x8xf32> to vector<4x16x8xf32>
    %34 = arith.truncf %33 : vector<4x16x8xf32> to vector<4x16x8xbf16>
    %c0_10 = arith.constant 0 : index
    %c0_11 = arith.constant 0 : index
    %c0_12 = arith.constant 0 : index
    %35 = vector.load %arg2[%c0_10, %c0_11, %c0_12] : memref<4x8x32xbf16, #tpu.memory_space<vmem>>, vector<4x8x32xbf16>
    "tpu.trace_start"() <{level = 10 : i32, message = "hnd,hdo->hno"}> : () -> ()
    %cst_13 = arith.constant dense<0.000000e+00> : vector<4x16x32xf32>
    %36 = tpu.matmul %34, %35, %cst_13 {dimension_numbers = #tpu.dot_dimension_numbers<[2], [1], [1], [2], [0, 0, 0, 1, 1, 2], [0], [0]>} : vector<4x16x8xbf16>, vector<4x8x32xbf16>, vector<4x16x32xf32> -> vector<4x16x32xf32>
    "tpu.trace_stop"() : () -> ()
    %cst_14 = arith.constant dense<0.000000e+00> : vector<16x32xf32>
    %37 = vector.multi_reduction <add>, %36, %cst_14 [0] : vector<4x16x32xf32> to vector<16x32xf32>
    %38 = vector.broadcast %3 : vector<1x32xf32> to vector<16x32xf32>
    %39 = arith.addf %37, %38 : vector<16x32xf32>
    %40 = arith.addf %0, %39 : vector<16x32xf32>
    %41 = arith.mulf %40, %40 : vector<16x32xf32>
    %cst_15 = arith.constant dense<0.000000e+00> : vector<16xf32>
    %42 = vector.multi_reduction <add>, %41, %cst_15 [1] : vector<16x32xf32> to vector<16xf32>
    %43 = vector.shape_cast %42 : vector<16xf32> to vector<16x1xf32>
    %cst_16 = arith.constant 3.200000e+01 : f32
    %44 = vector.broadcast %cst_16 : f32 to vector<16x1xf32>
    %45 = arith.divf %43, %44 : vector<16x1xf32>
    %cst_17 = arith.constant 1.1920929E-7 : f32
    %46 = vector.broadcast %cst_17 : f32 to vector<16x1xf32>
    %47 = arith.addf %45, %46 : vector<16x1xf32>
    %48 = math.rsqrt %47 : vector<16x1xf32>
    %49 = vector.broadcast %48 : vector<16x1xf32> to vector<16x32xf32>
    %50 = arith.mulf %40, %49 : vector<16x32xf32>
    %51 = vector.broadcast %4 : vector<1x32xf32> to vector<16x32xf32>
    %52 = arith.mulf %50, %51 : vector<16x32xf32>
    %53 = arith.truncf %52 : vector<16x32xf32> to vector<16x32xbf16>
    %c0_18 = arith.constant 0 : index
    %c0_19 = arith.constant 0 : index
    %54 = vector.load %arg3[%c0_18, %c0_19] : memref<32x128xbf16, #tpu.memory_space<vmem>>, vector<32x128xbf16>
    %cst_20 = arith.constant dense<0.000000e+00> : vector<16x128xf32>
    %55 = tpu.matmul %53, %54, %cst_20 {dimension_numbers = #tpu.dot_dimension_numbers<[1], [0], [0], [1], [0, 0, 1, 1], [], []>} : vector<16x32xbf16>, vector<32x128xbf16>, vector<16x128xf32> -> vector<16x128xf32>
    %56 = vector.extract_strided_slice %55 {offsets = [0, 0], sizes = [16, 64], strides = [1, 1]} : vector<16x128xf32> to vector<16x64xf32>
    %57 = vector.extract_strided_slice %55 {offsets = [0, 64], sizes = [16, 64], strides = [1, 1]} : vector<16x128xf32> to vector<16x64xf32>
    %58 = arith.negf %56 : vector<16x64xf32>
    %59 = math.exp %58 : vector<16x64xf32>
    %cst_21 = arith.constant 1.000000e+00 : f32
    %60 = vector.broadcast %cst_21 : f32 to vector<16x64xf32>
    %61 = arith.addf %60, %59 : vector<16x64xf32>
    %62 = arith.divf %60, %61 : vector<16x64xf32>
    %63 = arith.mulf %56, %62 : vector<16x64xf32>
    %64 = arith.mulf %63, %57 : vector<16x64xf32>
    %65 = arith.truncf %64 : vector<16x64xf32> to vector<16x64xbf16>
    %c0_22 = arith.constant 0 : index
    %c0_23 = arith.constant 0 : index
    %66 = vector.load %arg4[%c0_22, %c0_23] : memref<64x32xbf16, #tpu.memory_space<vmem>>, vector<64x32xbf16>
    %cst_24 = arith.constant dense<0.000000e+00> : vector<16x32xf32>
    %67 = tpu.matmul %65, %66, %cst_24 {dimension_numbers = #tpu.dot_dimension_numbers<[1], [0], [0], [1], [0, 0, 1, 1], [], []>} : vector<16x64xbf16>, vector<64x32xbf16>, vector<16x32xf32> -> vector<16x32xf32>
    %68 = arith.addf %52, %67 : vector<16x32xf32>
    %69 = arith.mulf %68, %68 : vector<16x32xf32>
    %cst_25 = arith.constant dense<0.000000e+00> : vector<16xf32>
    %70 = vector.multi_reduction <add>, %69, %cst_25 [1] : vector<16x32xf32> to vector<16xf32>
    %71 = vector.shape_cast %70 : vector<16xf32> to vector<16x1xf32>
    %cst_26 = arith.constant 3.200000e+01 : f32
    %72 = vector.broadcast %cst_26 : f32 to vector<16x1xf32>
    %73 = arith.divf %71, %72 : vector<16x1xf32>
    %cst_27 = arith.constant 1.1920929E-7 : f32
    %74 = vector.broadcast %cst_27 : f32 to vector<16x1xf32>
    %75 = arith.addf %73, %74 : vector<16x1xf32>
    %76 = math.rsqrt %75 : vector<16x1xf32>
    %77 = vector.broadcast %76 : vector<16x1xf32> to vector<16x32xf32>
    %78 = arith.mulf %68, %77 : vector<16x32xf32>
    %79 = vector.broadcast %5 : vector<1x32xf32> to vector<16x32xf32>
    %80 = arith.mulf %78, %79 : vector<16x32xf32>
    %c0_28 = arith.constant 0 : index
    %c0_29 = arith.constant 0 : index
    %81 = vector.load %arg6[%c0_28, %c0_29] : memref<16x32xf32, #tpu.memory_space<vmem>>, vector<16x32xf32>
    tpu.vector_store %arg6[%c0_28, %c0_29], %80 {strides = array<i32>} : memref<16x32xf32, #tpu.memory_space<vmem>>, vector<16x32xf32>,
    return
  }
}

</mosaic_0001>

<bundles_post_ra>
// kernel: tpu_custom_call.1
= control target key start
LH: loop header
LB: loop body
LE: loop exit
PB: predicated region body
PF: predicated region fallthrough
CT: control target
= control target key end

     0   :  { %v2517_v1 = vmov 0.0   ;;  %vm2518_vm0 = vmmov 0   ;;  %vm89_vm1 = vcmask 261120   ;;  %s2966_s0 = inlined_call_operand.vmem [shape: f32[16,32], index: 0, kind: input, shape index: {}]   ;;  %s2967_s1 = inlined_call_operand.vmem [shape: bf16[12,32,8], index: 1, kind: input, shape index: {}]   ;;  %s2968_s2 = inlined_call_operand.vmem [shape: bf16[4,8,32], index: 2, kind: input, shape index: {}]   ;;  %s2969_s3 = inlined_call_operand.vmem [shape: bf16[32,128], index: 3, kind: input, shape index: {}]   ;;  %s2970_s4 = inlined_call_operand.vmem [shape: bf16[64,32], index: 4, kind: input, shape index: {}]   ;;  %s2971_s5 = inlined_call_operand.vmem [shape: f32[3,32], index: 5, kind: input, shape index: {}]   ;;  %s2972_s6 = inlined_call_operand.hbm [shape: f32[16,32], index: 6, kind: output, shape index: {}]  }
   0x1   :  { %v2413_v0 = vld [vmem:[%s2967_s1] sm:$0xff]   ;;  %2171 = vmatprep.subr.bf16.mxu0 %v2517_v1  ;;  %v2414_v2 = vld [vmem:[%s2967_s1 + $0x8] sm:$0xff]   ;;  %2179 = vmatprep.subr.bf16.mxu1 %v2517_v1  ;;  %v2415_v3 = vld [vmem:[%s2967_s1 + $0x10] sm:$0xff]  }
   0x2   :  { %2172 = vmatpush3.bf16.msra.mxu0 %v2413_v0  ;;  %2175 = vmatprep.mubr.msk.bf16.mxu0 %vm2518_vm0, %v2517_v1  ;;  %v25_v4 = vld [vmem:[%s2966_s0] sm:$0xff]  ;;  %v26_v5 = vld [vmem:[%s2966_s0 + $0x8] sm:$0xff]  ;;  %v2417_v7 = vld [vmem:[%s2967_s1 + $0x18] sm:$0xff]  }
   0x3   :  { %2173 = vmatprep.subr.bf16.mxu0 %v2517_v1  ;;  %2183 = vmatprep.mubr.msk.bf16.mxu1 %vm2518_vm0, %v2517_v1  ;;  %v2580_v6 = vpack.c.bf16 %v26_v5, %v25_v4  ;;  %v2416_v8 = vld [vmem:[%s2967_s1 + $0x20] sm:$0xff]   ;;  %v2419_v9 = vld [vmem:[%s2967_s1 + $0x30] sm:$0xff]   ;;  %v2418_v10 = vld [vmem:[%s2967_s1 + $0x28] sm:$0xff]  }
   0x4   :  { %2180 = vmatpush3.bf16.msra.mxu1 %v2415_v3  ;;  %v2421_v11 = vld [vmem:[%s2967_s1 + $0x38] sm:$0xff]   ;;  %v2420_v12 = vld [vmem:[%s2967_s1 + $0x40] sm:$0xff]   ;;  %v2423_v13 = vld [vmem:[%s2967_s1 + $0x50] sm:$0xff]  }
   0x5   :  { %2181 = vmatprep.subr.bf16.mxu1 %v2517_v1  ;;  %v2422_v14 = vld [vmem:[%s2967_s1 + $0x48] sm:$0xff]   ;;  %v2424_v15 = vld [vmem:[%s2967_s1 + $0x58] sm:$0xff]   ;;  %v2425_v16 = vld [vmem:[%s2967_s1 + $0x60] sm:$0xff]  }
   0x6   :  { %2174 = vmatpush3.bf16.msra.mxu0 %v2414_v2  ;;  %v2427_v17 = vld [vmem:[%s2967_s1 + $0x70] sm:$0xff]   ;;  %v2426_v18 = vld [vmem:[%s2967_s1 + $0x68] sm:$0xff]  }
   0x7   :  { %2187 = vmatprep.subr.bf16.mxu0 %v2517_v1 }
   0x8   :  { %2182 = vmatpush3.bf16.msra.mxu1 %v2417_v7 }
   0x9   :  { %2176 = vmatmul.mubr.msk.bf16.vlgmr.msra.gmra.mrb[0].mxu0 %vm89_vm1, %v2580_v6  ;;  %2195 = vmatprep.subr.bf16.mxu1 %v2517_v1 }
   0xa   :  { %2188 = vmatpush3.bf16.msra.mxu0 %v2416_v8  ;;  %2191 = vmatprep.mubr.msk.bf16.mxu0 %vm2518_vm0, %v2517_v1 }
   0xb   :  { %2189 = vmatprep.subr.bf16.mxu0 %v2517_v1  ;;  %2184 = vmatmul.mubr.msk.bf16.vlgmr.msra.gmra.mrb[0].mxu1 %vm89_vm1, %v2580_v6 }
   0xc   :  { %2196 = vmatpush3.bf16.msra.mxu1 %v2419_v9  ;;  %2199 = vmatprep.mubr.msk.bf16.mxu1 %vm2518_vm0, %v2517_v1 }
   0xd   :  { %2197 = vmatprep.subr.bf16.mxu1 %v2517_v1 }
   0xe   :  { %2190 = vmatpush3.bf16.msra.mxu0 %v2418_v10 }
   0xf   :  { %2203 = vmatprep.subr.bf16.mxu0 %v2517_v1 }
  0x10   :  { %2198 = vmatpush3.bf16.msra.mxu1 %v2421_v11 }
  0x11   :  { %2192 = vmatmul.mubr.msk.bf16.vlgmr.msra.gmra.mrb[4].mxu0 %vm89_vm1, %v2580_v6  ;;  %2211 = vmatprep.subr.bf16.mxu1 %v2517_v1 }
  0x12   :  { %2204 = vmatpush3.bf16.msra.mxu0 %v2420_v12  ;;  %2207 = vmatprep.mubr.msk.bf16.mxu0 %vm2518_vm0, %v2517_v1 }
  0x13   :  { %2205 = vmatprep.subr.bf16.mxu0 %v2517_v1  ;;  %2200 = vmatmul.mubr.msk.bf16.vlgmr.msra.gmra.mrb[4].mxu1 %vm89_vm1, %v2580_v6 }
  0x14   :  { %2212 = vmatpush3.bf16.msra.mxu1 %v2423_v13  ;;  %2215 = vmatprep.mubr.msk.bf16.mxu1 %vm2518_vm0, %v2517_v1 }
  0x15   :  { %2213 = vmatprep.subr.bf16.mxu1 %v2517_v1 }
  0x16   :  { %2206 = vmatpush3.bf16.msra.mxu0 %v2422_v14 }
  0x17   :  { %2219 = vmatprep.subr.bf16.mxu0 %v2517_v1 }
  0x18   :  { %2214 = vmatpush3.bf16.msra.mxu1 %v2424_v15 }
  0x19   :  { %2208 = vmatmul.mubr.msk.bf16.vlgmr.msra.gmra.mrb[8].mxu0 %vm89_vm1, %v2580_v6  ;;  %2227 = vmatprep.subr.bf16.mxu1 %v2517_v1 }
  0x1a   :  { %2220 = vmatpush3.bf16.msra.mxu0 %v2425_v16  ;;  %2223 = vmatprep.mubr.msk.bf16.mxu0 %vm2518_vm0, %v2517_v1 }
  0x1b   :  { %11 = vsyncpa [#allocation3], 0  ;;  %2216 = vmatmul.mubr.msk.bf16.vlgmr.msra.gmra.mrb[8].mxu1 %vm89_vm1, %v2580_v6  ;;  %2221 = vmatprep.subr.bf16.mxu0 %v2517_v1  ;;  %v2428_v19 = vld [vmem:[%s2967_s1 + $0x78] sm:$0xff]   ;;  %v2429_v20 = vld [vmem:[%s2967_s1 + $0x80] sm:$0xff]   ;;  %vm741_vm2 = vcmask 64512   ;;  %vm1209_vm3 = vcmask 1043456  }
  0x1c   :  { %2228 = vmatpush3.bf16.msra.mxu1 %v2427_v17  ;;  %2231 = vmatprep.mubr.msk.bf16.mxu1 %vm2518_vm0, %v2517_v1  ;;  %v2430_v21 = vld [vmem:[%s2967_s1 + $0x88] sm:$0xff]   ;;  %v2431_v22 = vld [vmem:[%s2967_s1 + $0x90] sm:$0xff]   ;;  %v2432_v23 = vld [vmem:[%s2967_s1 + $0x98] sm:$0xff]   ;;  %s2519_s22 = smov 64   ;;  %vm1934_vm4 = vcmask 523264  }
  0x1d   :  { %2229 = vmatprep.subr.bf16.mxu1 %v2517_v1  ;;  %v2433_v24 = vld [vmem:[%s2967_s1 + $0xa0] sm:$0xff]   ;;  %v2434_v25 = vld [vmem:[%s2967_s1 + $0xb0] sm:$0xff]   ;;  %v2435_v26 = vld [vmem:[%s2967_s1 + $0xa8] sm:$0xff]  }
  0x1e   :  { %2222 = vmatpush3.bf16.msra.mxu0 %v2426_v18  ;;  %v2436_v27 = vld [vmem:[%s2967_s1 + $0xb8] sm:$0xff]  }
  0x1f   :  { %2235 = vmatprep.subr.bf16.mxu0 %v2517_v1 }
  0x20   :  { %2230 = vmatpush3.bf16.msra.mxu1 %v2428_v19 }
  0x21   :  { %2224 = vmatmul.mubr.msk.bf16.vlgmr.msra.gmra.mrb[12].mxu0 %vm89_vm1, %v2580_v6  ;;  %2243 = vmatprep.subr.bf16.mxu1 %v2517_v1 }
  0x22   :  { %2236 = vmatpush3.bf16.msra.mxu0 %v2429_v20  ;;  %2239 = vmatprep.mubr.msk.bf16.mxu0 %vm2518_vm0, %v2517_v1 }
  0x23   :  { %2232 = vmatmul.mubr.msk.bf16.vlgmr.msra.gmra.mrb[12].mxu1 %vm89_vm1, %v2580_v6  ;;  %2237 = vmatprep.subr.bf16.mxu0 %v2517_v1 }
  0x24   :  { %2247 = vmatprep.mubr.msk.bf16.mxu1 %vm2518_vm0, %v2517_v1  ;;  %2244 = vmatpush3.bf16.msra.mxu1 %v2431_v22 }
  0x25   :  { %2245 = vmatprep.subr.bf16.mxu1 %v2517_v1 }
  0x26   :  { %2238 = vmatpush3.bf16.msra.mxu0 %v2430_v21 }
  0x27   :  { %2251 = vmatprep.subr.bf16.mxu0 %v2517_v1 }
  0x28   :  { %2246 = vmatpush3.bf16.msra.mxu1 %v2432_v23 }
  0x29   :  { %2240 = vmatmul.mubr.msk.bf16.vlgmr.msra.gmra.mrb[16].mxu0 %vm89_vm1, %v2580_v6  ;;  %2259 = vmatprep.subr.bf16.mxu1 %v2517_v1 }
  0x2a   :  { %2255 = vmatprep.mubr.msk.bf16.mxu0 %vm2518_vm0, %v2517_v1  ;;  %2252 = vmatpush3.bf16.msra.mxu0 %v2433_v24 }
  0x2b   :  { %2248 = vmatmul.mubr.msk.bf16.vlgmr.msra.gmra.mrb[16].mxu1 %vm89_vm1, %v2580_v6  ;;  %2253 = vmatprep.subr.bf16.mxu0 %v2517_v1 }
  0x2c   :  { %2260 = vmatpush3.bf16.msra.mxu1 %v2434_v25  ;;  %2263 = vmatprep.mubr.msk.bf16.mxu1 %vm2518_vm0, %v2517_v1 }
  0x2d   :  { %2261 = vmatprep.subr.bf16.mxu1 %v2517_v1 }
  0x2e   :  { %2254 = vmatpush3.bf16.msra.mxu0 %v2435_v26 }
  0x2f   :  { %2267 = vmatprep.subr.bf16.mxu0 %v2517_v1 }
  0x30   :  { %2262 = vmatpush3.bf16.msra.mxu1 %v2436_v27 }
  0x31   :  { %2256 = vmatmul.mubr.msk.bf16.vlgmr.msra.gmra.mrb[20].mxu0 %vm89_vm1, %v2580_v6  ;;  %2273 = vmatprep.subr.bf16.mxu1 %v2517_v1 }
  0x32   :  { %2269 = vmatprep.mubr.msk.bf16.mxu0 %vm2518_vm0, %v2517_v1 }
  0x33   :  { %2264 = vmatmul.mubr.msk.bf16.vlgmr.msra.gmra.mrb[20].mxu1 %vm89_vm1, %v2580_v6 }
  0x34   :  { %2275 = vmatprep.mubr.msk.bf16.mxu1 %vm2518_vm0, %v2517_v1 }
  0xdc   :  { %v127_v28 = vpop.f32.mrb[0].mxu0 }
  0xdd   :  { %v2177_v29 = vpop.f32.mrb[1].mxu0  ;;  %v717_v58 = vpack.c.bf16 %v127_v28, %v127_v28 }
  0xde   :  { %v130_v30 = vpop.f32.mrb[2].mxu0  ;;  %v180_v31 = vpop.f32.mrb[0].mxu1 }
  0xdf   :  { %v2178_v32 = vpop.f32.mrb[3].mxu0  ;;  %v2185_v33 = vpop.f32.mrb[1].mxu1  ;;  %v718_v0 = vpack.c.bf16 %v130_v30, %v130_v30  ;;  %v719_v9 = vpack.c.bf16 %v180_v31, %v180_v31 }
  0xe0   :  { %v183_v34 = vpop.f32.mrb[2].mxu1 }
  0xe1   :  { %v2186_v35 = vpop.f32.mrb[3].mxu1  ;;  %v720_v11 = vpack.c.bf16 %v183_v34, %v183_v34 }
  0xe4   :  { %v2716_v36 = vpop.f32.mrb[4].mxu0 }
  0xe5   :  { %v2193_v37 = vpop.f32.mrb[5].mxu0  ;;  %v721_v15 = vpack.c.bf16 %v2716_v36, %v2716_v36 }
  0xe6   :  { %v2718_v38 = vpop.f32.mrb[6].mxu0  ;;  %v2720_v39 = vpop.f32.mrb[4].mxu1 }
  0xe7   :  { %v2194_v40 = vpop.f32.mrb[7].mxu0  ;;  %v2201_v41 = vpop.f32.mrb[5].mxu1  ;;  %v722_v17 = vpack.c.bf16 %v2718_v38, %v2718_v38  ;;  %v723_v19 = vpack.c.bf16 %v2720_v39, %v2720_v39 }
  0xe8   :  { %v2722_v42 = vpop.f32.mrb[6].mxu1 }
  0xe9   :  { %v2202_v43 = vpop.f32.mrb[7].mxu1  ;;  %v724_v20 = vpack.c.bf16 %v2722_v42, %v2722_v42 }
  0xec   :  { %v339_v44 = vpop.f32.mrb[8].mxu0 }
  0xed   :  { %v725_v45 = vpack.c.bf16 %v339_v44, %v339_v44  ;;  %v2209_v46 = vpop.f32.mrb[9].mxu0 }
  0xee   :  { %v342_v47 = vpop.f32.mrb[10].mxu0  ;;  %v392_v48 = vpop.f32.mrb[8].mxu1 }
  0xef   :  { %v746_v49 = vsel %vm741_vm2, %v725_v45, 0  ;;  %v726_v50 = vpack.c.bf16 %v342_v47, %v342_v47  ;;  %v2210_v51 = vpop.f32.mrb[11].mxu0  ;;  %v2217_v52 = vpop.f32.mrb[9].mxu1  ;;  %v727_v55 = vpack.c.bf16 %v392_v48, %v392_v48 }
  0xf0   :  { %2268 = vmatpush3.bf16.xpose.msra.mxu0 %v746_v49  ;;  %v395_v53 = vpop.f32.mrb[10].mxu1 }
  0xf1   :  { %v792_v54 = vsel %vm741_vm2, %v726_v50, 0  ;;  %v2218_v56 = vpop.f32.mrb[11].mxu1  ;;  %2279 = vmatprep.subr.bf16.mxu0 %v2517_v1  ;;  %v838_v59 = vsel %vm741_vm2, %v727_v55, 0  ;;  %v728_v60 = vpack.c.bf16 %v395_v53, %v395_v53 }
  0xf2   :  { %2274 = vmatpush3.bf16.xpose.msra.mxu1 %v792_v54 }
  0xf3   :  { %2285 = vmatprep.subr.bf16.mxu1 %v2517_v1  ;;  %v884_v5 = vsel %vm741_vm2, %v728_v60, 0 }
  0xf4   :  { %v445_v57 = vpop.f32.mrb[12].mxu0 }
  0xf5   :  { %v2225_v61 = vpop.f32.mrb[13].mxu0  ;;  %v729_v6 = vpack.c.bf16 %v445_v57, %v445_v57 }
  0xf6   :  { %v448_v62 = vpop.f32.mrb[14].mxu0  ;;  %v498_v63 = vpop.f32.mrb[12].mxu1 }
  0xf7   :  { %2270 = vmatmul.mubr.msk.bf16.vlgmr.msra.gmra.mrb[24].mxu0 %vm741_vm2, %v717_v58  ;;  %v2226_v2 = vpop.f32.mrb[15].mxu0  ;;  %v2233_v3 = vpop.f32.mrb[13].mxu1  ;;  %v730_v8 = vpack.c.bf16 %v448_v62, %v448_v62  ;;  %v930_v10 = vsel %vm741_vm2, %v729_v6, 0  ;;  %v731_v13 = vpack.c.bf16 %v498_v63, %v498_v63 }
  0xf8   :  { %2280 = vmatpush3.bf16.xpose.msra.mxu0 %v838_v59  ;;  %2281 = vmatprep.mubr.msk.bf16.mxu0 %vm2518_vm0, %v2517_v1  ;;  %v501_v4 = vpop.f32.mrb[14].mxu1 }
  0xf9   :  { %2276 = vmatmul.mubr.msk.bf16.vlgmr.msra.gmra.mrb[24].mxu1 %vm741_vm2, %v718_v0  ;;  %2291 = vmatprep.subr.bf16.mxu0 %v2517_v1  ;;  %v2234_v7 = vpop.f32.mrb[15].mxu1  ;;  %v976_v12 = vsel %vm741_vm2, %v730_v8, 0  ;;  %v732_v14 = vpack.c.bf16 %v501_v4, %v501_v4  ;;  %v1022_v16 = vsel %vm741_vm2, %v731_v13, 0 }
  0xfa   :  { %2286 = vmatpush3.bf16.xpose.msra.mxu1 %v884_v5  ;;  %2287 = vmatprep.mubr.msk.bf16.mxu1 %vm2518_vm0, %v2517_v1 }
  0xfb   :  { %2297 = vmatprep.subr.bf16.mxu1 %v2517_v1  ;;  %v1068_v18 = vsel %vm741_vm2, %v732_v14, 0 }
  0xfc   :  { %v551_v21 = vpop.f32.mrb[16].mxu0 }
  0xfd   :  { %v733_v22 = vpack.c.bf16 %v551_v21, %v551_v21  ;;  %v2241_v23 = vpop.f32.mrb[17].mxu0 }
  0xfe   :  { %v554_v24 = vpop.f32.mrb[18].mxu0  ;;  %v2773_v28 = vpop.f32.mrb[16].mxu1 }
  0xff   :  { %2282 = vmatmul.mubr.msk.bf16.vlgmr.msra.gmra.mrb[28].mxu0 %vm741_vm2, %v719_v9  ;;  %v1211_v25 = vsel %vm1209_vm3, %v733_v22, 0  ;;  %v734_v26 = vpack.c.bf16 %v554_v24, %v554_v24  ;;  %v2242_v27 = vpop.f32.mrb[19].mxu0  ;;  %v2249_v30 = vpop.f32.mrb[17].mxu1 }
 0x100   :  { %2292 = vmatpush3.bf16.xpose.msra.mxu0 %v930_v10  ;;  %2293 = vmatprep.mubr.msk.bf16.mxu0 %vm2518_vm0, %v2517_v1  ;;  %v2777_v31 = vpop.f32.mrb[18].mxu1 }
 0x101   :  { %2288 = vmatmul.mubr.msk.bf16.vlgmr.msra.gmra.mrb[28].mxu1 %vm741_vm2, %v720_v11  ;;  %2303 = vmatprep.subr.bf16.mxu0 %v2517_v1  ;;  %v1257_v29 = vsel %vm1209_vm3, %v734_v26, 0  ;;  %v2250_v32 = vpop.f32.mrb[19].mxu1 }
 0x102   :  { %2298 = vmatpush3.bf16.xpose.msra.mxu1 %v976_v12  ;;  %2299 = vmatprep.mubr.msk.bf16.mxu1 %vm2518_vm0, %v2517_v1 }
 0x103   :  { %2309 = vmatprep.subr.bf16.mxu1 %v2517_v1 }
 0x104   :  { %v2780_v33 = vpop.f32.mrb[20].mxu0 }
 0x105   :  { %v2257_v34 = vpop.f32.mrb[21].mxu0 }
 0x106   :  { %v2782_v35 = vpop.f32.mrb[22].mxu0  ;;  %v2784_v36 = vpop.f32.mrb[20].mxu1 }
 0x107   :  { %2294 = vmatmul.mubr.msk.bf16.vlgmr.msra.gmra.mrb[32].mxu0 %vm741_vm2, %v721_v15  ;;  %v2258_v37 = vpop.f32.mrb[23].mxu0  ;;  %v2265_v38 = vpop.f32.mrb[21].mxu1 }
 0x108   :  { %2304 = vmatpush3.bf16.xpose.msra.mxu0 %v1022_v16  ;;  %2305 = vmatprep.mubr.msk.bf16.mxu0 %vm2518_vm0, %v2517_v1  ;;  %v2786_v39 = vpop.f32.mrb[22].mxu1 }
 0x109   :  { %2300 = vmatmul.mubr.msk.bf16.vlgmr.msra.gmra.mrb[32].mxu1 %vm741_vm2, %v722_v17  ;;  %2315 = vmatprep.subr.bf16.mxu0 %v2517_v1  ;;  %v2266_v40 = vpop.f32.mrb[23].mxu1 }
 0x10a   :  { %2310 = vmatpush3.bf16.xpose.msra.mxu1 %v1068_v18  ;;  %2311 = vmatprep.mubr.msk.bf16.mxu1 %vm2518_vm0, %v2517_v1 }
 0x10b   :  { %2321 = vmatprep.subr.bf16.mxu1 %v2517_v1 }
 0x10f   :  { %2306 = vmatmul.mubr.msk.bf16.vlgmr.msra.gmra.mrb[36].mxu0 %vm741_vm2, %v723_v19 }
 0x110   :  { %2317 = vmatprep.mubr.msk.bf16.mxu0 %vm2518_vm0, %v2517_v1  ;;  %2316 = vmatpush3.bf16.msra.mxu0 %v1211_v25 }
 0x111   :  { %2312 = vmatmul.mubr.msk.bf16.vlgmr.msra.gmra.mrb[36].mxu1 %vm741_vm2, %v724_v20  ;;  %2327 = vmatprep.subr.bf16.mxu0 %v2517_v1 }
 0x112   :  { %2323 = vmatprep.mubr.msk.bf16.mxu1 %vm2518_vm0, %v2517_v1  ;;  %2322 = vmatpush3.bf16.msra.mxu1 %v1257_v29 }
 0x113   :  { %2333 = vmatprep.subr.bf16.mxu1 %v2517_v1 }
 0x1ca   :  { %v782_v41 = vpop.f32.mrb[24].mxu0 }
 0x1cb   :  { %v2271_v42 = vpop.f32.mrb[25].mxu0  ;;  %v1110_v43 = vsel %vm741_vm2, %v782_v41, -inf }
 0x1cc   :  { %v828_v44 = vpop.f32.mrb[24].mxu1  ;;  %1111 = vmax.xlane.f32.xlu0 %v1110_v43  ;;  %v785_v45 = vpop.f32.mrb[26].mxu0 }
 0x1cd   :  { %v2272_v46 = vpop.f32.mrb[27].mxu0  ;;  %v2277_v47 = vpop.f32.mrb[25].mxu1  ;;  %v1113_v50 = vsel %vm741_vm2, %v828_v44, -inf }
 0x1ce   :  { %v831_v48 = vpop.f32.mrb[26].mxu1 }
 0x1cf   :  { %v2278_v49 = vpop.f32.mrb[27].mxu1 }
 0x1d0   :  { %1114 = vmax.xlane.f32.xlu0 %v1113_v50 }
 0x1d2   :  { %v874_v51 = vpop.f32.mrb[28].mxu0 }
 0x1d3   :  { %v2283_v52 = vpop.f32.mrb[29].mxu0  ;;  %v1116_v53 = vsel %vm741_vm2, %v874_v51, -inf }
 0x1d4   :  { %v920_v54 = vpop.f32.mrb[28].mxu1  ;;  %1117 = vmax.xlane.f32.xlu1 %v1116_v53  ;;  %v877_v55 = vpop.f32.mrb[30].mxu0 }
 0x1d5   :  { %v2284_v56 = vpop.f32.mrb[31].mxu0  ;;  %v2289_v57 = vpop.f32.mrb[29].mxu1  ;;  %v1119_v60 = vsel %vm741_vm2, %v920_v54, -inf }
 0x1d6   :  { %v923_v58 = vpop.f32.mrb[30].mxu1 }
 0x1d7   :  { %v2290_v59 = vpop.f32.mrb[31].mxu1 }
 0x1d8   :  { %1120 = vmax.xlane.f32.xlu1 %v1119_v60 }
 0x1da   :  { %v966_v61 = vpop.f32.mrb[32].mxu0 }
 0x1db   :  { %v2295_v62 = vpop.f32.mrb[33].mxu0  ;;  %v1122_v63 = vsel %vm741_vm2, %v966_v61, -inf }
 0x1dc   :  { %v1012_v0 = vpop.f32.mrb[32].mxu1  ;;  %1123 = vmax.xlane.f32.xlu0 %v1122_v63  ;;  %v969_v2 = vpop.f32.mrb[34].mxu0 }
 0x1dd   :  { %v2296_v3 = vpop.f32.mrb[35].mxu0  ;;  %v2301_v4 = vpop.f32.mrb[33].mxu1  ;;  %v1125_v5 = vsel %vm741_vm2, %v1012_v0, -inf }
 0x1de   :  { %v1015_v6 = vpop.f32.mrb[34].mxu1  ;;  %1126 = vmax.xlane.f32.xlu1 %v1125_v5  ;;  %v735_v5 = vpack.c.bf16 %v2773_v28, %v2773_v28 }
 0x1df   :  { %v2302_v7 = vpop.f32.mrb[35].mxu1 }
 0x1e2   :  { %v1058_v8 = vpop.f32.mrb[36].mxu0 }
 0x1e3   :  { %v2307_v9 = vpop.f32.mrb[37].mxu0  ;;  %v1128_v10 = vsel %vm741_vm2, %v1058_v8, -inf }
 0x1e4   :  { %v1104_v11 = vpop.f32.mrb[36].mxu1  ;;  %1129 = vmax.xlane.f32.xlu0 %v1128_v10  ;;  %v1061_v12 = vpop.f32.mrb[38].mxu0  ;;  %v1303_v10 = vsel %vm1209_vm3, %v735_v5, 0 }
 0x1e5   :  { %v2308_v13 = vpop.f32.mrb[39].mxu0  ;;  %v2313_v14 = vpop.f32.mrb[37].mxu1  ;;  %v1131_v15 = vsel %vm741_vm2, %v1104_v11, -inf }
 0x1e6   :  { %v1107_v16 = vpop.f32.mrb[38].mxu1  ;;  %1132 = vmax.xlane.f32.xlu1 %v1131_v15 }
 0x1e7   :  { %v2314_v17 = vpop.f32.mrb[39].mxu1 }
 0x259   :  { %v1112_v18 = vpop.xlane.xlu0 %1111 }
 0x25a   :  { %v1134_v19 = vsub.f32 %v782_v41, %v1112_v18 }
 0x25c   :  { %v1142_v20 = vmul.f32 1.442695, %v1134_v19 }
 0x25d   :  { %v1115_v21 = vpop.xlane.xlu0 %1114 }
 0x25e   :  { %2443 = vpow2.f32 %v1142_v20  ;;  %v1135_v22 = vsub.f32 %v828_v44, %v1115_v21  ;;  %v738_v21 = vpack.c.bf16 %v2782_v35, %v2782_v35  ;;  %v739_v35 = vpack.c.bf16 %v2784_v36, %v2784_v36 }
 0x260   :  { %v1144_v23 = vmul.f32 1.442695, %v1135_v22 }
 0x261   :  { %v1118_v24 = vpop.xlane.xlu1 %1117 }
 0x262   :  { %2445 = vpow2.f32 %v1144_v23  ;;  %v1136_v25 = vsub.f32 %v874_v51, %v1118_v24 }
 0x264   :  { %v1146_v26 = vmul.f32 1.442695, %v1136_v25 }
 0x265   :  { %v1121_v27 = vpop.xlane.xlu1 %1120 }
 0x266   :  { %2447 = vpow2.f32 %v1146_v26  ;;  %v1137_v29 = vsub.f32 %v920_v54, %v1121_v27  ;;  %v1441_v26 = vsel %vm1209_vm3, %v738_v21, 0 }
 0x268   :  { %v2444_v30 = vpop.eup %2443  ;;  %v1148_v32 = vmul.f32 1.442695, %v1137_v29 }
 0x269   :  { %v1124_v34 = vpop.xlane.xlu0 %1123  ;;  %v1158_v37 = vsel %vm741_vm2, %v2444_v30, 0.0 }
 0x26a   :  { %2449 = vpow2.f32 %v1148_v32  ;;  %v1138_v38 = vsub.f32 %v966_v61, %v1124_v34  ;;  %1159 = vadd.xlane.f32.xlu0 %v1158_v37  ;;  %v1487_v34 = vsel %vm1209_vm3, %v739_v35, 0  ;;  %v740_v37 = vpack.c.bf16 %v2786_v39, %v2786_v39  ;;  %v28_v35 = vld [vmem:[%s2971_s5] sm:$0x7] }
 0x26b   :  { %v1127_v40 = vpop.xlane.xlu1 %1126 }
 0x26c   :  { %v2446_v41 = vpop.eup %2445  ;;  %v1150_v42 = vmul.f32 1.442695, %v1138_v38  ;;  %v1139_v43 = vsub.f32 %v1012_v0, %v1127_v40  ;;  %v1533_v40 = vsel %vm1209_vm3, %v740_v37, 0 }
 0x26d   :  { %v1161_v44 = vsel %vm741_vm2, %v2446_v41, 0.0 }
 0x26e   :  { %2451 = vpow2.f32 %v1150_v42  ;;  %v1152_v45 = vmul.f32 1.442695, %v1139_v43  ;;  %1162 = vadd.xlane.f32.xlu1 %v1161_v44 }
 0x270   :  { %v2448_v46 = vpop.eup %2447  ;;  %2453 = vpow2.f32 %v1152_v45  ;;  %v1579_v45 = vld [vmem:[%s2968_s2] sm:$0xf] }
 0x271   :  { %v1130_v47 = vpop.xlane.xlu0 %1129  ;;  %v1164_v48 = vsel %vm741_vm2, %v2448_v46, 0.0 }
 0x272   :  { %v1140_v49 = vsub.f32 %v1058_v8, %v1130_v47  ;;  %1165 = vadd.xlane.f32.xlu0 %v1164_v48  ;;  %v1580_v47 = vld [vmem:[%s2968_s2 + $0x4] sm:$0xf] }
 0x273   :  { %v1133_v50 = vpop.xlane.xlu1 %1132  ;;  %v1634_v48 = vsel %vm1209_vm3, %v1580_v47, 0 }
 0x274   :  { %v2450_v51 = vpop.eup %2449  ;;  %v1154_v52 = vmul.f32 1.442695, %v1140_v49  ;;  %v1141_v53 = vsub.f32 %v1104_v11, %v1133_v50  ;;  %v736_v11 = vpack.c.bf16 %v2777_v31, %v2777_v31  ;;  %v737_v31 = vpack.c.bf16 %v2780_v33, %v2780_v33 }
 0x275   :  { %v1167_v54 = vsel %vm741_vm2, %v2450_v51, 0.0 }
 0x276   :  { %2455 = vpow2.f32 %v1154_v52  ;;  %v1156_v55 = vmul.f32 1.442695, %v1141_v53  ;;  %1168 = vadd.xlane.f32.xlu1 %v1167_v54  ;;  %v1349_v16 = vsel %vm1209_vm3, %v736_v11, 0  ;;  %v1395_v20 = vsel %vm1209_vm3, %v737_v31, 0  ;;  %v1581_v52 = vld [vmem:[%s2968_s2 + $0x8] sm:$0xf] }
 0x278   :  { %v2800_v56 = vpop.eup %2451  ;;  %2457 = vpow2.f32 %v1156_v55 }
 0x279   :  { %v1170_v57 = vsel %vm741_vm2, %v2800_v56, 0.0 }
 0x27a   :  { %v2804_v58 = vpop.eup %2453  ;;  %1171 = vadd.xlane.f32.xlu0 %v1170_v57  ;;  %v1681_v57 = vsel %vm1209_vm3, %v1581_v52, 0 }
 0x27b   :  { %v1173_v59 = vsel %vm741_vm2, %v2804_v58, 0.0 }
 0x27c   :  { %1174 = vadd.xlane.f32.xlu1 %v1173_v59 }
 0x280   :  { %v2808_v60 = vpop.eup %2455 }
 0x281   :  { %v1176_v61 = vsel %vm741_vm2, %v2808_v60, 0.0 }
 0x282   :  { %v2812_v62 = vpop.eup %2457  ;;  %1177 = vadd.xlane.f32.xlu0 %v1176_v61 }
 0x283   :  { %v1179_v63 = vsel %vm741_vm2, %v2812_v62, 0.0 }
 0x284   :  { %1180 = vadd.xlane.f32.xlu1 %v1179_v63  ;;  %v1582_v63 = vld [vmem:[%s2968_s2 + $0xc] sm:$0xf] }
 0x285   :  { %v1728_v5 = vsel %vm1209_vm3, %v1582_v63, 0 }
 0x2f7   :  { %v1160_v0 = vpop.xlane.xlu0 %1159 }
 0x2f8   :  { %2459 = vrcp.f32 %v1160_v0 }
 0x2fb   :  { %v1163_v2 = vpop.xlane.xlu1 %1162 }
 0x2fc   :  { %2461 = vrcp.f32 %v1163_v2 }
 0x2ff   :  { %v1166_v3 = vpop.xlane.xlu0 %1165 }
 0x300   :  { %2463 = vrcp.f32 %v1166_v3 }
 0x302   :  { %v2460_v4 = vpop.eup %2459 }
 0x303   :  { %v1190_v6 = vmul.f32 %v2460_v4, %v2444_v30  ;;  %v1169_v7 = vpop.xlane.xlu1 %1168 }
 0x304   :  { %2465 = vrcp.f32 %v1169_v7 }
 0x305   :  { %v1198_v8 = vpack.c.bf16 %v1190_v6, %v1190_v6 }
 0x306   :  { %v2462_v9 = vpop.eup %2461 }
 0x307   :  { %v1191_v12 = vmul.f32 %v2462_v9, %v2446_v41  ;;  %2318 = vmatmul.mubr.msk.bf16.vlgmr.msra.gmra.mrb[40].mxu0 %vm741_vm2, %v1198_v8  ;;  %v1172_v13 = vpop.xlane.xlu0 %1171 }
 0x308   :  { %2328 = vmatpush3.bf16.msra.mxu0 %v1303_v10  ;;  %2467 = vrcp.f32 %v1172_v13  ;;  %2329 = vmatprep.mubr.msk.bf16.mxu0 %vm2518_vm0, %v2517_v1 }
 0x309   :  { %v1175_v28 = vpop.xlane.xlu1 %1174  ;;  %v1199_v14 = vpack.c.bf16 %v1191_v12, %v1191_v12  ;;  %2339 = vmatprep.subr.bf16.mxu0 %v2517_v1 }
 0x30a   :  { %v2464_v15 = vpop.eup %2463  ;;  %2469 = vrcp.f32 %v1175_v28 }
 0x30b   :  { %v1192_v17 = vmul.f32 %v2464_v15, %v2448_v46  ;;  %2324 = vmatmul.mubr.msk.bf16.vlgmr.msra.gmra.mrb[40].mxu1 %vm741_vm2, %v1199_v14  ;;  %v1587_v46 = vsel %vm1209_vm3, %v1579_v45, 0 }
 0x30c   :  { %2334 = vmatpush3.bf16.msra.mxu1 %v1349_v16  ;;  %2335 = vmatprep.mubr.msk.bf16.mxu1 %vm2518_vm0, %v2517_v1 }
 0x30d   :  { %v1200_v18 = vpack.c.bf16 %v1192_v17, %v1192_v17  ;;  %2345 = vmatprep.subr.bf16.mxu1 %v2517_v1 }
 0x30e   :  { %v2466_v19 = vpop.eup %2465 }
 0x30f   :  { %v1193_v22 = vmul.f32 %v2466_v19, %v2450_v51  ;;  %2330 = vmatmul.mubr.msk.bf16.vlgmr.msra.gmra.mrb[44].mxu0 %vm741_vm2, %v1200_v18  ;;  %v1178_v33 = vpop.xlane.xlu0 %1177 }
 0x310   :  { %2340 = vmatpush3.bf16.msra.mxu0 %v1395_v20  ;;  %2471 = vrcp.f32 %v1178_v33  ;;  %2341 = vmatprep.mubr.msk.bf16.mxu0 %vm2518_vm0, %v2517_v1 }
 0x311   :  { %v1181_v23 = vpop.xlane.xlu1 %1180  ;;  %v1201_v24 = vpack.c.bf16 %v1193_v22, %v1193_v22  ;;  %2351 = vmatprep.subr.bf16.mxu0 %v2517_v1 }
 0x312   :  { %v2468_v25 = vpop.eup %2467  ;;  %2473 = vrcp.f32 %v1181_v23  ;;  %v1785_v23 = vlaneseq }
 0x313   :  { %v1194_v27 = vmul.f32 %v2468_v25, %v2800_v56  ;;  %2336 = vmatmul.mubr.msk.bf16.vlgmr.msra.gmra.mrb[44].mxu1 %vm741_vm2, %v1201_v24 }
 0x314   :  { %v2470_v29 = vpop.eup %2469  ;;  %2346 = vmatpush3.bf16.msra.mxu1 %v1441_v26  ;;  %2347 = vmatprep.mubr.msk.bf16.mxu1 %vm2518_vm0, %v2517_v1  ;;  %v1786_v24 = vshrl.u32 %v1785_v23, 7 }
 0x315   :  { %v1195_v30 = vmul.f32 %v2470_v29, %v2804_v58  ;;  %v1202_v32 = vpack.c.bf16 %v1194_v27, %v1194_v27  ;;  %2357 = vmatprep.subr.bf16.mxu1 %v2517_v1 }
 0x316   :  { %v1812_v25 = vsub.s32 1, %v1786_v24  ;;  %v1999_v26 = vsub.s32 2, %v1786_v24 }
 0x317   :  { %2342 = vmatmul.mubr.msk.bf16.vlgmr.msra.gmra.mrb[48].mxu0 %vm741_vm2, %v1202_v32  ;;  %v1203_v36 = vpack.c.bf16 %v1195_v30, %v1195_v30 }
 0x318   :  { %2352 = vmatpush3.bf16.msra.mxu0 %v1487_v34  ;;  %2353 = vmatprep.mubr.msk.bf16.mxu0 %vm2518_vm0, %v2517_v1  ;;  %v2903_v27 = vrot.slane %v28_v35, %v1812_v25  ;;  %v2905_v29 = vrot.slane %v28_v35, %v1999_v26  ;;  %v2440_v25 = vld [vmem:[%s2970_s4 + $0x8] sm:$0xff]   ;;  %v2441_v26 = vld [vmem:[%s2970_s4 + $0x10] sm:$0xff]  }
 0x319   :  { %2363 = vmatprep.subr.bf16.mxu0 %v2517_v1 }
 0x31a   :  { %v2472_v38 = vpop.eup %2471 }
 0x31b   :  { %v1196_v41 = vmul.f32 %v2472_v38, %v2808_v60  ;;  %2348 = vmatmul.mubr.msk.bf16.vlgmr.msra.gmra.mrb[48].mxu1 %vm741_vm2, %v1203_v36 }
 0x31c   :  { %v2474_v42 = vpop.eup %2473  ;;  %2358 = vmatpush3.bf16.msra.mxu1 %v1533_v40  ;;  %2359 = vmatprep.mubr.msk.bf16.mxu1 %vm2518_vm0, %v2517_v1 }
 0x31d   :  { %v1197_v39 = vmul.f32 %v2474_v42, %v2812_v62  ;;  %v1204_v43 = vpack.c.bf16 %v1196_v41, %v1196_v41  ;;  %2369 = vmatprep.subr.bf16.mxu1 %v2517_v1 }
 0x31f   :  { %2354 = vmatmul.mubr.msk.bf16.vlgmr.msra.gmra.mrb[52].mxu0 %vm741_vm2, %v1204_v43  ;;  %v1205_v44 = vpack.c.bf16 %v1197_v39, %v1197_v39 }
 0x320   :  { %2365 = vmatprep.mubr.msk.bf16.mxu0 %vm2518_vm0, %v2517_v1  ;;  %2364 = vmatpush3.bf16.msra.mxu0 %v1587_v46 }
 0x321   :  { %2375 = vmatprep.subr.bf16.mxu0 %v2517_v1 }
 0x323   :  { %2360 = vmatmul.mubr.msk.bf16.vlgmr.msra.gmra.mrb[52].mxu1 %vm741_vm2, %v1205_v44 }
 0x324   :  { %2371 = vmatprep.mubr.msk.bf16.mxu1 %vm2518_vm0, %v2517_v1  ;;  %2370 = vmatpush3.bf16.msra.mxu1 %v1634_v48 }
 0x325   :  { %2381 = vmatprep.subr.bf16.mxu1 %v2517_v1 }
 0x3da   :  { %v1247_v49 = vpop.f32.mrb[40].mxu0 }
 0x3db   :  { %v2319_v50 = vpop.f32.mrb[41].mxu0 }
 0x3dc   :  { %v1250_v51 = vpop.f32.mrb[42].mxu0 }
 0x3dd   :  { %v2320_v53 = vpop.f32.mrb[43].mxu0 }
 0x3de   :  { %v1293_v54 = vpop.f32.mrb[40].mxu1 }
 0x3df   :  { %v1575_v55 = vpack.c.bf16 %v1293_v54, %v1247_v49  ;;  %v2325_v56 = vpop.f32.mrb[41].mxu1 }
 0x3e0   :  { %v1296_v58 = vpop.f32.mrb[42].mxu1 }
 0x3e1   :  { %v2326_v59 = vpop.f32.mrb[43].mxu1  ;;  %2366 = vmatmul.mubr.msk.bf16.vlgmr.msra.gmra.mrb[56].mxu0 %vm741_vm2, %v1575_v55  ;;  %v1787_v55 = vsub.s32 0, %v1786_v24  ;;  %v2439_v24 = vld [vmem:[%s2970_s4] sm:$0xff]  }
 0x3e2   :  { %v1339_v60 = vpop.f32.mrb[44].mxu0  ;;  %2376 = vmatpush3.bf16.msra.mxu0 %v1681_v57  ;;  %2377 = vmatprep.mubr.msk.bf16.mxu0 %vm2518_vm0, %v2517_v1 }
 0x3e3   :  { %v2331_v61 = vpop.f32.mrb[45].mxu0  ;;  %2387 = vmatprep.subr.bf16.mxu0 %v2517_v1  ;;  %v1788_v57 = vrot.slane %v28_v35, %v1787_v55  ;;  %v2442_v35 = vld [vmem:[%s2970_s4 + $0x18] sm:$0xff]   ;;  %s2520_s4 = smov [#allocation2]  }
 0x3e4   :  { %v1342_v62 = vpop.f32.mrb[46].mxu0  ;;  %s2010_s23 = sshll.u32 %s2520_s4, 4  ;;  %s2011_s23 = int_to_ptr.vmem [resolvable:$true] %s2010_s23 }
 0x3e5   :  { %v2332_v0 = vpop.f32.mrb[47].mxu0  ;;  %s2493_s24 = scalar_lea.vmem %s2011_s23, 256  ;;  %p2498_p1 = scmp.lt.s32.totalorder %s2011_s23, %s2011_s23 }
 0x3e6   :  { %v1385_v2 = vpop.f32.mrb[44].mxu1  ;;  %p2494_p0 = scmp.ne.s32.totalorder %s2011_s23, %s2493_s24  ;;  %p2499_p2 = scmp.lt.s32.totalorder %s2493_s24, %s2493_s24 }
 0x3e7   :  { %v1576_v3 = vpack.c.bf16 %v1385_v2, %v1339_v60  ;;  %v2337_v4 = vpop.f32.mrb[45].mxu1 }
 0x3e8   :  { %v1388_v6 = vpop.f32.mrb[46].mxu1  ;;  %v2491_v4 = vld [vmem:[%s2966_s0] sm:$0xff]  ;;  %p2500_p3 = por %p2499_p2, %p2498_p1 }
 0x3e9   :  { %v2338_v7 = vpop.f32.mrb[47].mxu1  ;;  %2372 = vmatmul.mubr.msk.bf16.vlgmr.msra.gmra.mrb[56].mxu1 %vm741_vm2, %v1576_v3 }
 0x3ea   :  { %v1431_v8 = vpop.f32.mrb[48].mxu0  ;;  %2382 = vmatpush3.bf16.msra.mxu1 %v1728_v5  ;;  %2383 = vmatprep.mubr.msk.bf16.mxu1 %vm2518_vm0, %v2517_v1  ;;  %v2492_v7 = vld [vmem:[%s2966_s0 + $0x8] sm:$0xff]  ;;  %p2501_p4 = pnand %p2500_p3, %p2494_p0 }
 0x3eb   :  { %v2343_v9 = vpop.f32.mrb[49].mxu0  ;;  %2395 = vmatprep.subr.bf16.mxu1 %v2517_v1 }
 0x3ec   :  { %v1434_v10 = vpop.f32.mrb[50].mxu0 }
 0x3ed   :  { %v2344_v11 = vpop.f32.mrb[51].mxu0 }
 0x3ee   :  { %v1477_v12 = vpop.f32.mrb[48].mxu1 }
 0x3ef   :  { %v1577_v13 = vpack.c.bf16 %v1477_v12, %v1431_v8  ;;  %v2349_v28 = vpop.f32.mrb[49].mxu1  ;;  %v2437_v12 = vld [vmem:[%s2969_s3] sm:$0xff]  }
 0x3f0   :  { %v1480_v14 = vpop.f32.mrb[50].mxu1 }
 0x3f1   :  { %v2350_v15 = vpop.f32.mrb[51].mxu1  ;;  %2378 = vmatmul.mubr.msk.bf16.vlgmr.msra.gmra.mrb[60].mxu0 %vm741_vm2, %v1577_v13  ;;  %v2438_v13 = vld [vmem:[%s2969_s3 + $0x8] sm:$0xff]  }
 0x3f2   :  { %v1523_v16 = vpop.f32.mrb[52].mxu0  ;;  %2391 = vmatprep.mubr.msk.bf16.mxu0 %vm2518_vm0, %v2517_v1  ;;  %2388 = vmatpush3.bf16.msra.mxu0 %v2437_v12 }
 0x3f3   :  { %v2355_v31 = vpop.f32.mrb[53].mxu0  ;;  %2389 = vmatprep.subr.bf16.mxu0 %v2517_v1 }
 0x3f4   :  { %v1526_v17 = vpop.f32.mrb[54].mxu0 }
 0x3f5   :  { %v2356_v18 = vpop.f32.mrb[55].mxu0 }
 0x3f6   :  { %v1569_v19 = vpop.f32.mrb[52].mxu1  ;;  %2390 = vmatpush3.bf16.msra.mxu0 %v2438_v13 }
 0x3f7   :  { %v1578_v20 = vpack.c.bf16 %v1569_v19, %v1523_v16  ;;  %v2361_v21 = vpop.f32.mrb[53].mxu1 }
 0x3f8   :  { %v1572_v22 = vpop.f32.mrb[54].mxu1 }
 0x3f9   :  { %v2362_v33 = vpop.f32.mrb[55].mxu1  ;;  %2384 = vmatmul.mubr.msk.bf16.vlgmr.msra.gmra.mrb[60].mxu1 %vm741_vm2, %v1578_v20 }
 0x3fa   :  { %2403 = vmatprep.mubr.msk.bf16.mxu1 %vm2518_vm0, %v2517_v1  ;;  %2396 = vmatpush3.bf16.msra.mxu1 %v2439_v24 }
 0x3fb   :  { %2397 = vmatprep.subr.bf16.mxu1 %v2517_v1 }
 0x3fe   :  { %2398 = vmatpush3.bf16.msra.mxu1 %v2440_v25 }
 0x3ff   :  { %2399 = vmatprep.subr.bf16.mxu1 %v2517_v1 }
 0x402   :  { %2400 = vmatpush3.bf16.msra.mxu1 %v2441_v26 }
 0x403   :  { %2401 = vmatprep.subr.bf16.mxu1 %v2517_v1 }
 0x406   :  { %2402 = vmatpush3.bf16.msra.mxu1 %v2442_v35 }
 0x4b4   :  { %v1623_v30 = vpop.f32.mrb[56].mxu0 }
 0x4b5   :  { %v2367_v32 = vpop.f32.mrb[57].mxu0  ;;  %v1771_v38 = vsel %vm89_vm1, %v1623_v30, 0.0 }
 0x4b6   :  { %v1626_v34 = vpop.f32.mrb[58].mxu0 }
 0x4b7   :  { %v2368_v37 = vpop.f32.mrb[59].mxu0  ;;  %v1778_v43 = vsel %vm89_vm1, %v1626_v34, 0.0 }
 0x4bc   :  { %v1670_v36 = vpop.f32.mrb[56].mxu1 }
 0x4bd   :  { %v1772_v40 = vsel %vm89_vm1, %v1670_v36, 0.0  ;;  %v2373_v41 = vpop.f32.mrb[57].mxu1 }
 0x4be   :  { %v1773_v42 = vadd.f32 %v1772_v40, %v1771_v38  ;;  %v1673_v39 = vpop.f32.mrb[58].mxu1 }
 0x4bf   :  { %v1779_v44 = vsel %vm89_vm1, %v1673_v39, 0.0  ;;  %v2374_v45 = vpop.f32.mrb[59].mxu1 }
 0x4c0   :  { %v1780_v46 = vadd.f32 %v1779_v44, %v1778_v43 }
 0x4c4   :  { %v1717_v47 = vpop.f32.mrb[60].mxu0 }
 0x4c5   :  { %v1774_v48 = vsel %vm89_vm1, %v1717_v47, 0.0  ;;  %v2379_v49 = vpop.f32.mrb[61].mxu0 }
 0x4c6   :  { %v1775_v50 = vadd.f32 %v1774_v48, %v1773_v42  ;;  %v1720_v51 = vpop.f32.mrb[62].mxu0 }
 0x4c7   :  { %v1781_v52 = vsel %vm89_vm1, %v1720_v51, 0.0  ;;  %v2380_v53 = vpop.f32.mrb[63].mxu0 }
 0x4c8   :  { %v1782_v54 = vadd.f32 %v1781_v52, %v1780_v46 }
 0x4cc   :  { %v1764_v56 = vpop.f32.mrb[60].mxu1 }
 0x4cd   :  { %v1776_v58 = vsel %vm89_vm1, %v1764_v56, 0.0  ;;  %v2385_v59 = vpop.f32.mrb[61].mxu1 }
 0x4ce   :  { %v1777_v60 = vadd.f32 %v1776_v58, %v1775_v50  ;;  %v1767_v61 = vpop.f32.mrb[62].mxu1 }
 0x4cf   :  { %v1783_v62 = vsel %vm89_vm1, %v1767_v61, 0.0  ;;  %v2386_v63 = vpop.f32.mrb[63].mxu1 }
 0x4d0   :  { %v1789_v0 = vadd.f32 %v1788_v57, %v1777_v60  ;;  %v1784_v2 = vadd.f32 %v1783_v62, %v1782_v54 }
 0x4d2   :  { %v1790_v3 = vadd.f32 %v1788_v57, %v1784_v2  ;;  %v1791_v5 = vadd.f32 %v2491_v4, %v1789_v0 }
 0x4d4   :  { %v1793_v6 = vmul.f32 %v1791_v5, %v1791_v5  ;;  %v1792_v8 = vadd.f32 %v2492_v7, %v1790_v3 }
 0x4d6   :  { %v1795_v9 = vsel %vm89_vm1, %v1793_v6, 0.0  ;;  %v1794_v10 = vmul.f32 %v1792_v8, %v1792_v8 }
 0x4d7   :  { %1796 = vadd.xlane.f32.xlu0 %v1795_v9 }
 0x4d8   :  { %v1798_v11 = vsel %vm89_vm1, %v1794_v10, 0.0 }
 0x4d9   :  { %1799 = vadd.xlane.f32.xlu1 %v1798_v11 }
 0x564   :  { %v1797_v28 = vpop.xlane.xlu0 %1796 }
 0x565   :  { %v1802_v14 = vmul.f32 0.03125, %v1797_v28 }
 0x566   :  { %v1800_v15 = vpop.xlane.xlu1 %1799 }
 0x567   :  { %v1804_v16 = vadd.f32 1.1920929e-07, %v1802_v14  ;;  %v1803_v31 = vmul.f32 0.03125, %v1800_v15 }
 0x569   :  { %2475 = vrsqrt.f32 %v1804_v16  ;;  %v1805_v17 = vadd.f32 1.1920929e-07, %v1803_v31 }
 0x56b   :  { %2477 = vrsqrt.f32 %v1805_v17 }
 0x573   :  { %v2476_v18 = vpop.eup %2475 }
 0x574   :  { %v1808_v19 = vmul.f32 %v2476_v18, %v1791_v5 }
 0x575   :  { %v2478_v20 = vpop.eup %2477 }
 0x576   :  { %v1809_v21 = vmul.f32 %v2478_v20, %v1792_v8  ;;  %v1814_v22 = vmul.f32 %v2903_v27, %v1808_v19 }
 0x578   :  { %v1815_v33 = vmul.f32 %v2903_v27, %v1809_v21 }
 0x57a   :  { %v1816_v23 = vpack.c.bf16 %v1815_v33, %v1814_v22 }
 0x57c   :  { %2392 = vmatmul.mubr.msk.bf16.vlgmr.msra.gmra.mrb[64].mxu0 %vm89_vm1, %v1816_v23 }
 0x64f   :  { %v1870_v27 = vpop.f32.mrb[64].mxu0 }
 0x650   :  { %1893 = vrot.lane.b32.xlu0 %v1870_v27, %s2519_s22  ;;  %v2393_v30 = vpop.f32.mrb[65].mxu0  ;;  %v2080_v37 = vmul.f32 -1.442695, %v1870_v27 }
 0x651   :  { %v1873_v32 = vpop.f32.mrb[66].mxu0 }
 0x652   :  { %1895 = vrot.lane.b32.xlu1 %v1873_v32, %s2519_s22  ;;  %v2394_v34 = vpop.f32.mrb[67].mxu0  ;;  %v2081_v36 = vmul.f32 -1.442695, %v1873_v32  ;;  %2479 = vpow2.f32 %v2080_v37 }
 0x654   :  { %2481 = vpow2.f32 %v2081_v36 }
 0x65c   :  { %v2480_v38 = vpop.eup %2479 }
 0x65d   :  { %v1883_v41 = vadd.f32 1.0, %v2480_v38 }
 0x65e   :  { %v2482_v40 = vpop.eup %2481 }
 0x65f   :  { %v1884_v1 = vadd.f32 1.0, %v2482_v40  ;;  %2483 = vrcp.f32 %v1883_v41 }
 0x661   :  { %2485 = vrcp.f32 %v1884_v1 }
 0x669   :  { %v2484_v42 = vpop.eup %2483 }
 0x66a   :  { %v1889_v44 = vmul.f32 %v2484_v42, %v1870_v27 }
 0x66b   :  { %v2486_v39 = vpop.eup %2485 }
 0x66c   :  { %v1890_v45 = vmul.f32 %v2486_v39, %v1873_v32 }
 0x6c2   :  { %v1894_v43 = vpop.permute.xlu0 %1893 }
 0x6c3   :  { %v1899_v47 = vmul.f32 %v1894_v43, %v1889_v44 }
 0x6c4   :  { %v1896_v46 = vpop.permute.xlu1 %1895 }
 0x6c5   :  { %v1900_v48 = vmul.f32 %v1896_v46, %v1890_v45 }
 0x6c7   :  { %v1901_v49 = vpack.c.bf16 %v1900_v48, %v1899_v47 }
 0x6c9   :  { %2404 = vmatmul.mubr.msk.bf16.vlgmr.msra.gmra.mrb[64].mxu1 %vm1934_vm4, %v1901_v49 }
 0x79c   :  { %v1972_v50 = vpop.f32.mrb[64].mxu1 }
 0x79d   :  { %v1979_v51 = vadd.f32 %v1972_v50, %v1814_v22  ;;  %v2405_v52 = vpop.f32.mrb[65].mxu1 }
 0x79e   :  { %v1975_v53 = vpop.f32.mrb[66].mxu1 }
 0x79f   :  { %v1980_v54 = vadd.f32 %v1975_v53, %v1815_v33  ;;  %v2406_v55 = vpop.f32.mrb[67].mxu1  ;;  %v1981_v56 = vmul.f32 %v1979_v51, %v1979_v51 }
 0x7a1   :  { %v1983_v57 = vsel %vm89_vm1, %v1981_v56, 0.0  ;;  %v1982_v58 = vmul.f32 %v1980_v54, %v1980_v54 }
 0x7a2   :  { %1984 = vadd.xlane.f32.xlu1 %v1983_v57 }
 0x7a3   :  { %v1986_v59 = vsel %vm89_vm1, %v1982_v58, 0.0 }
 0x7a4   :  { %1987 = vadd.xlane.f32.xlu0 %v1986_v59 }
 0x82f   :  { %v1985_v60 = vpop.xlane.xlu1 %1984 }
 0x830   :  { %v1989_v61 = vmul.f32 0.03125, %v1985_v60 }
 0x831   :  { %v1988_v62 = vpop.xlane.xlu0 %1987 }
 0x832   :  { %v1991_v63 = vadd.f32 1.1920929e-07, %v1989_v61  ;;  %v1990_v0 = vmul.f32 0.03125, %v1988_v62 }
 0x834   :  { %2487 = vrsqrt.f32 %v1991_v63  ;;  %v1992_v2 = vadd.f32 1.1920929e-07, %v1990_v0 }
 0x836   :  { %2489 = vrsqrt.f32 %v1992_v2 }
 0x83e   :  { %v2488_v3 = vpop.eup %2487 }
 0x83f   :  { %v1995_v4 = vmul.f32 %v2488_v3, %v1979_v51 }
 0x840   :  { %v2490_v5 = vpop.eup %2489 }
 0x841   :  { %v1996_v6 = vmul.f32 %v2490_v5, %v1980_v54  ;;  %v2001_v7 = vmul.f32 %v2905_v29, %v1995_v4 }
 0x843   :  { %v2002_v8 = vmul.f32 %v2905_v29, %v1996_v6  ;;  %2003 = vst.msk [vmem:[#allocation2] sm:$0xff] %vm89_vm1, %v2001_v7 }
 0x845   :  { %2004 = vst.msk [vmem:[#allocation2 + $0x8] sm:$0xff] %vm89_vm1, %v2002_v8 }
 0x846   :  { %2504 = shalt.err (!%p2501_p4)
}
 0x847   :  { %s2505_s26 = scalar_lea.hbm %s2972_s6, 256 }
 0x848   :  { %p2506_p5 = scmp.ne.s32.totalorder %s2972_s6, %s2505_s26  ;;  %p2509_p6 = scmp.lt.u32.totalorder %s2505_s26, %s2972_s6 }
 0x84a   :  { %p2511_p7 = pnand %p2509_p6, %p2506_p5 }
 0x84c   :  { %2514 = shalt.err (!%p2511_p7)
}
 0x84d   :  { %s2521_s7 = smov 128   ;;  %s2522_s2 = smov 8  }
 0x84e   :  { %2016 = dma.vmem_to_hbm [thread:$0]  %s2011_s23, 256, %s2972_s6, [#allocation3], %s2521_s7, %s2521_s7, %s2522_s2  }
 0x84f   :  { %2515 = dma.done.wait [#allocation3], 256  }
 0x850   :  { %2516 = vsyncadd [#allocation3], 4294967040 }
 0x851   :  { %2020 = vsyncpa [#allocation3], 1 }

</bundles_post_ra>
